<compile_context>
chip_gen: v7x
topology: tpu7x:2x2x1
jax: 0.10.0
libtpu: 0.0.40
codegen_flags: <defaults>
</compile_context>

<pallas_src>
import functools

import jax
import jax.numpy as jnp
from jax.experimental import pallas as pl
from jax.experimental.pallas import tpu as pltpu

LANE = 128


def _round_up(v, m):
    return ((v + m - 1) // m) * m


def autoenc_kernel(x_ref, w1_ref, b1_ref, w2_ref, b2_ref, o_ref, *, mxu_bf16):
    # x_ref : (tb, 100)                w1_ref : (100, 128)  f32 or bf16 (padded cols)
    # b1_ref: (1, 128)  f32 (padded)   w2_ref : (128, 100)  f32 or bf16 (padded rows)
    # b2_ref: (1, 100)  f32            o_ref  : (tb, 100)   f32 or bf16
    x = x_ref[...]
    if mxu_bf16:
        # Feed the MXU bf16 operands directly (no VPU upcast pass).
        x = x.astype(jnp.bfloat16)
    else:
        # Exact-f32 path: upcast right after load (v5e has no bf16 VPU/EUP).
        x = x.astype(jnp.float32)

    # First linear: (tb,100) @ (100,128) -> (tb,128) f32 accumulation, lane-dense.
    h = jnp.dot(x, w1_ref[...], preferred_element_type=jnp.float32)
    h = h + b1_ref[...]            # bias add in f32

    # Nonlinearity on the EUP path in f32; padded lanes are exactly tanh(0)=0.
    h = jnp.tanh(h)

    if mxu_bf16:
        h = h.astype(jnp.bfloat16)  # bf16 MXU operand for the second matmul

    # Second linear: (tb,128) @ (128,100) -> (tb,100).  Padded W2 rows are zero.
    y = jnp.dot(h, w2_ref[...], preferred_element_type=jnp.float32)
    y = y + b2_ref[...]            # bias add in f32

    o_ref[...] = y.astype(o_ref.dtype)


def prepare_params(w1, b1, w2, b2, *, mxu_bf16=False):
    """One-time parameter prep: zero-pad the hidden dim to 128 lanes and
    (optionally) cast the matmul weights to bf16 for the native MXU path.

    w1: (100, 40)  b1: (40,)  w2: (40, 100)  b2: (100,)
      (weights stored as (in_features, out_features), i.e. transposed vs torch)
    """
    d_in, d_hidden = w1.shape
    d_out = w2.shape[1]
    assert b1.shape == (d_hidden,) and w2.shape == (d_hidden, d_out)
    assert b2.shape == (d_out,)

    h_pad = max(LANE, _round_up(d_hidden, LANE))
    w_dtype = jnp.bfloat16 if mxu_bf16 else jnp.float32

    w1_p = jnp.pad(w1.astype(jnp.float32),
                   ((0, 0), (0, h_pad - d_hidden))).astype(w_dtype)
    b1_p = jnp.pad(b1.astype(jnp.float32).reshape(1, d_hidden),
                   ((0, 0), (0, h_pad - d_hidden)))              # stays f32
    w2_p = jnp.pad(w2.astype(jnp.float32),
                   ((0, h_pad - d_hidden), (0, 0))).astype(w_dtype)
    b2_p = b2.astype(jnp.float32).reshape(1, d_out)              # stays f32
    return w1_p, b1_p, w2_p, b2_p


def autoenc_forward(x, params, *, block_b=4096, out_dtype=jnp.float32):
    """Forward pass of `autoenc`.

    x      : (B, 100), f32 or bf16 (bf16 halves the HBM read stream).
    params : output of prepare_params().
    out_dtype: f32 (default, matches torch) or bf16 (opt-in, halves write stream).
    Returns (B, d_out) in out_dtype.
    """
    w1_p, b1_p, w2_p, b2_p = params
    B, D_in = x.shape
    h_pad = w1_p.shape[1]
    D_out = w2_p.shape[1]
    assert w1_p.shape == (D_in, h_pad)
    mxu_bf16 = (w1_p.dtype == jnp.bfloat16)

    in_itemsize = jnp.dtype(x.dtype).itemsize
    out_itemsize = jnp.dtype(out_dtype).itemsize

    # Batch tile: multiple of 8 sublanes (16 when x is bf16 for clean packing).
    tile_mult = 16 if in_itemsize == 2 else 8
    block_b = max(tile_mult, _round_up(block_b, tile_mult))
    if B <= 2 * tile_mult:
        tb = B                                 # single full-array block
    else:
        # Guarantee >= 2 grid steps so the "parallel" axis splits across
        # v7x's two TensorCores; cap at block_b for HBM pipelining.
        tb = min(block_b, _round_up(pl.cdiv(B, 2), tile_mult))
    grid = (pl.cdiv(B, tb),)

    # Explicit scoped-VMEM budget: double-buffered x/y tiles + f32 temporaries
    # + resident weights, with headroom.  Keeps big tiles legal on v5e's 16 MiB
    # default and inside v7x's 64 MiB physical VMEM.
    weight_bytes = (w1_p.size * w1_p.dtype.itemsize
                    + w2_p.size * w2_p.dtype.itemsize
                    + (b1_p.size + b2_p.size) * 4)
    vmem_bytes = (2 * tb * D_in * in_itemsize        # x, double-buffered
                  + 2 * tb * D_out * out_itemsize    # y, double-buffered
                  + 4 * tb * h_pad * 4               # h + temporaries (generous)
                  + weight_bytes
                  + (4 << 20))                       # slack
    vmem_bytes = int(min(max(vmem_bytes, 32 << 20), 44 << 20))

    cost = pl.CostEstimate(
        flops=2 * B * (D_in * h_pad + h_pad * D_out),   # MXU-visible (padded)
        transcendentals=B * h_pad,                      # tanh over padded lanes
        bytes_accessed=(B * D_in * in_itemsize          # x in
                        + B * D_out * out_itemsize      # y out
                        + weight_bytes),
    )

    kernel = functools.partial(autoenc_kernel, mxu_bf16=mxu_bf16)

    return pl.pallas_call(
        kernel,
        out_shape=jax.ShapeDtypeStruct((B, D_out), out_dtype),
        grid=grid,
        in_specs=[
            pl.BlockSpec((tb, D_in), lambda i: (i, 0)),       # x: batch-tiled
            pl.BlockSpec((D_in, h_pad), lambda i: (0, 0)),    # W1: VMEM-resident
            pl.BlockSpec((1, h_pad), lambda i: (0, 0)),       # b1
            pl.BlockSpec((h_pad, D_out), lambda i: (0, 0)),   # W2
            pl.BlockSpec((1, D_out), lambda i: (0, 0)),       # b2
        ],
        out_specs=pl.BlockSpec((tb, D_out), lambda i: (i, 0)),
        compiler_params=pltpu.CompilerParams(
            dimension_semantics=("parallel",),   # independent batch rows
            vmem_limit_bytes=vmem_bytes,
        ),
        cost_estimate=cost,
    )(x, w1_p, b1_p, w2_p, b2_p)


def init_params(key):
    """Deterministic init mimicking torch.nn.Linear default:
    uniform(-1/sqrt(fan_in), 1/sqrt(fan_in)) for weights and biases."""
    k1, k2, k3, k4 = jax.random.split(key, 4)
    bound1 = 1.0 / jnp.sqrt(100.0)
    bound2 = 1.0 / jnp.sqrt(40.0)
    # Stored as (in_features, out_features) — already transposed vs torch.
    w1 = jax.random.uniform(k1, (100, 40), jnp.float32, -bound1, bound1)
    b1 = jax.random.uniform(k2, (40,), jnp.float32, -bound1, bound1)
    w2 = jax.random.uniform(k3, (40, 100), jnp.float32, -bound2, bound2)
    b2 = jax.random.uniform(k4, (100,), jnp.float32, -bound2, bound2)
    return w1, b1, w2, b2


if __name__ == "__main__":
    key = jax.random.PRNGKey(0)
    k_x, k_p = jax.random.split(key)
    w1, b1, w2, b2 = init_params(k_p)

    def ref_fn(xv):
        xf = xv.astype(jnp.float32)
        return jnp.tanh(xf @ w1 + b1) @ w2 + b2

    # One-time parameter prep (hoisted out of the per-call wrapper).
    params_f32 = prepare_params(w1, b1, w2, b2, mxu_bf16=False)
    params_bf16 = prepare_params(w1, b1, w2, b2, mxu_bf16=True)

    # --- small f32 batch (exact-f32 path; grid splits into 2 steps / megacore)
    B = 64
    x = jax.random.normal(k_x, (B, 100), jnp.float32)
    out = jax.block_until_ready(autoenc_forward(x, params_f32))
    assert out.shape == (B, 100)
    assert jnp.allclose(out, ref_fn(x), atol=1e-5, rtol=1e-5)

    # --- multi-block grid with a ragged final tile (exercises batch tiling) --
    B2 = 200
    x2 = jax.random.normal(jax.random.PRNGKey(1), (B2, 100), jnp.float32)
    out2 = jax.block_until_ready(autoenc_forward(x2, params_f32, block_b=64))
    assert jnp.allclose(out2, ref_fn(x2), atol=1e-5, rtol=1e-5)

    # --- opt-in fast path: bf16 x, bf16 MXU operands (f32 accumulation), bf16 y
    x_bf = x.astype(jnp.bfloat16)
    out_bf = jax.block_until_ready(
        autoenc_forward(x_bf, params_bf16, out_dtype=jnp.bfloat16))
    assert out_bf.shape == (B, 100) and out_bf.dtype == jnp.bfloat16
    assert jnp.allclose(out_bf.astype(jnp.float32), ref_fn(x_bf),
                        atol=3e-2, rtol=3e-2)

    # --- bf16 input with the exact-f32 compute path (semantics-preserving) ---
    out_bfin = jax.block_until_ready(autoenc_forward(x_bf, params_f32))
    assert jnp.allclose(out_bfin, ref_fn(x_bf), atol=1e-4, rtol=1e-4)

    print("KERNEL_OK")
</pallas_src>

<mosaic_0001>
module attributes {stable_mosaic.version = 11 : i64} {
  func.func @autoenc_kernel(%arg0: i32, %arg1: memref<32x100xf32, #tpu.memory_space<vmem>>, %arg2: memref<100x128xf32, #tpu.memory_space<vmem>>, %arg3: memref<1x128xf32, #tpu.memory_space<vmem>>, %arg4: memref<128x100xf32, #tpu.memory_space<vmem>>, %arg5: memref<1x100xf32, #tpu.memory_space<vmem>>, %arg6: memref<32x100xf32, #tpu.memory_space<vmem>>) attributes {dimension_semantics = [#tpu.dimension_semantics<parallel>], iteration_bounds = array<i64: 2>, scalar_prefetch = 0 : i64, scratch_operands = 0 : i64, tpu.core_type = #tpu.core_type<tc>, window_params = [{transform_indices = @transform_0, window_bounds = array<i64: 32, 100>}, {pipeline_mode = #tpu.pipeline_mode<synchronous>, transform_indices = @transform_1, window_bounds = array<i64: 100, 128>}, {pipeline_mode = #tpu.pipeline_mode<synchronous>, transform_indices = @transform_2, window_bounds = array<i64: 1, 128>}, {pipeline_mode = #tpu.pipeline_mode<synchronous>, transform_indices = @transform_3, window_bounds = array<i64: 128, 100>}, {pipeline_mode = #tpu.pipeline_mode<synchronous>, transform_indices = @transform_4, window_bounds = array<i64: 1, 100>}, {transform_indices = @transform_5, window_bounds = array<i64: 32, 100>}]} {
    %c0 = arith.constant 0 : index
    %c0_0 = arith.constant 0 : index
    %0 = vector.load %arg1[%c0, %c0_0] : memref<32x100xf32, #tpu.memory_space<vmem>>, vector<32x100xf32>
    %c0_1 = arith.constant 0 : index
    %c0_2 = arith.constant 0 : index
    %1 = vector.load %arg2[%c0_1, %c0_2] : memref<100x128xf32, #tpu.memory_space<vmem>>, vector<100x128xf32>
    %cst = arith.constant dense<0.000000e+00> : vector<32x128xf32>
    %2 = tpu.matmul %0, %1, %cst {dimension_numbers = #tpu.dot_dimension_numbers<[1], [0], [0], [1], [0, 0, 1, 1], [], []>} : vector<32x100xf32>, vector<100x128xf32>, vector<32x128xf32> -> vector<32x128xf32>
    %c0_3 = arith.constant 0 : index
    %c0_4 = arith.constant 0 : index
    %3 = vector.load %arg3[%c0_3, %c0_4] : memref<1x128xf32, #tpu.memory_space<vmem>>, vector<1x128xf32>
    %4 = vector.broadcast %3 : vector<1x128xf32> to vector<32x128xf32>
    %5 = arith.addf %2, %4 : vector<32x128xf32>
    %6 = math.tanh %5 : vector<32x128xf32>
    %c0_5 = arith.constant 0 : index
    %c0_6 = arith.constant 0 : index
    %7 = vector.load %arg4[%c0_5, %c0_6] : memref<128x100xf32, #tpu.memory_space<vmem>>, vector<128x100xf32>
    %cst_7 = arith.constant dense<0.000000e+00> : vector<32x100xf32>
    %8 = tpu.matmul %6, %7, %cst_7 {dimension_numbers = #tpu.dot_dimension_numbers<[1], [0], [0], [1], [0, 0, 1, 1], [], []>} : vector<32x128xf32>, vector<128x100xf32>, vector<32x100xf32> -> vector<32x100xf32>
    %c0_8 = arith.constant 0 : index
    %c0_9 = arith.constant 0 : index
    %9 = vector.load %arg5[%c0_8, %c0_9] : memref<1x100xf32, #tpu.memory_space<vmem>>, vector<1x100xf32>
    %10 = vector.broadcast %9 : vector<1x100xf32> to vector<32x100xf32>
    %11 = arith.addf %8, %10 : vector<32x100xf32>
    %c0_10 = arith.constant 0 : index
    %c0_11 = arith.constant 0 : index
    %12 = vector.load %arg6[%c0_10, %c0_11] : memref<32x100xf32, #tpu.memory_space<vmem>>, vector<32x100xf32>
    tpu.vector_store %arg6[%c0_10, %c0_11], %11 {strides = array<i32>} : memref<32x100xf32, #tpu.memory_space<vmem>>, vector<32x100xf32>,
    return
  }
  func.func @transform_0(%arg0: i32) -> (i32, i32) {
    %c0_i32 = arith.constant 0 : i32
    %c0_i32_0 = arith.constant 0 : i32
    return %arg0, %c0_i32 : i32, i32
  }
  func.func @transform_1(%arg0: i32) -> (i32, i32) {
    %c0_i32 = arith.constant 0 : i32
    %c0_i32_0 = arith.constant 0 : i32
    %c0_i32_1 = arith.constant 0 : i32
    return %c0_i32, %c0_i32_0 : i32, i32
  }
  func.func @transform_2(%arg0: i32) -> (i32, i32) {
    %c0_i32 = arith.constant 0 : i32
    %c0_i32_0 = arith.constant 0 : i32
    %c0_i32_1 = arith.constant 0 : i32
    return %c0_i32, %c0_i32_0 : i32, i32
  }
  func.func @transform_3(%arg0: i32) -> (i32, i32) {
    %c0_i32 = arith.constant 0 : i32
    %c0_i32_0 = arith.constant 0 : i32
    %c0_i32_1 = arith.constant 0 : i32
    return %c0_i32, %c0_i32_0 : i32, i32
  }
  func.func @transform_4(%arg0: i32) -> (i32, i32) {
    %c0_i32 = arith.constant 0 : i32
    %c0_i32_0 = arith.constant 0 : i32
    %c0_i32_1 = arith.constant 0 : i32
    return %c0_i32, %c0_i32_0 : i32, i32
  }
  func.func @transform_5(%arg0: i32) -> (i32, i32) {
    %c0_i32 = arith.constant 0 : i32
    %c0_i32_0 = arith.constant 0 : i32
    return %arg0, %c0_i32 : i32, i32
  }
}

</mosaic_0001>

<bundles_post_ra>
// kernel: tpu_custom_call.1
= control target key start
LH: loop header
LB: loop body
LE: loop exit
PB: predicated region body
PF: predicated region fallthrough
CT: control target
= control target key end

     0   :  { %10 = vsyncpa [#allocation3], 0  ;;  %s1082_s0 = inlined_call_operand.vmem [shape: f32[64,100], index: 0, kind: input, shape index: {}]   ;;  %s1083_s1 = inlined_call_operand.vmem [shape: f32[100,128], index: 1, kind: input, shape index: {}]   ;;  %s1084_s2 = inlined_call_operand.vmem [shape: f32[1,128], index: 2, kind: input, shape index: {}]   ;;  %s1085_s3 = inlined_call_operand.vmem [shape: f32[128,100], index: 3, kind: input, shape index: {}]   ;;  %s1086_s4 = inlined_call_operand.vmem [shape: f32[1,100], index: 4, kind: input, shape index: {}]   ;;  %s1087_s5 = inlined_call_operand.hbm [shape: f32[64,100], index: 5, kind: output, shape index: {}]  }
   0x1   :  { %12 = vsyncpa [#allocation3 + $0x1], 0  ;;  %s873_s18 = smov 0   ;;  %s875_s19 = smov 0  }
   0x2   :  { %s877_s20 = smov 0   ;;  %s879_s21 = smov 0  }
   0x3 LB: > { %s894_s22 = sadd.s32 4294967295, %s838_s21   ;;  %s544_s23 = sadd.s32 4294967294, %s838_s21   ;;  %s838_s21 = sphi %s879_s21, %s1093_s21   ;;  %s834_s20 = sphi %s877_s20, %s1092_s20   ;;  %s830_s19 = sphi %s875_s19, %s1091_s19   ;;  %s826_s18 = sphi %s873_s18, %s1090_s18  }
   0x4   : > { %s898_s24 = sadd.s32 1, %s838_s21   ;;  %s135_s25 = sadd.s32 1, %s834_s20 }
   0x5   : > { %s132_s26 = ssub.s32 %s838_s21, %s898_s24  ;;  %p145_p0 = scmp.ne.s32.totalorder %s834_s20, %s830_s19 }
   0x6   : > { %p133_p1 = scmp.eq.s32.totalorder %s132_s26, 0  ;;  %p146_p2 = scmp.eq.s32.totalorder %s894_s22, 1 }
   0x7   : > { %p151_p3 = scmp.ne.s32.totalorder %s830_s19, %s826_s18  ;;  %p152_p4 = scmp.eq.s32.totalorder %s544_s23, 1 }
   0x8   : > { %s909_s27 = scalar_select %p133_p1, %s834_s20, %s135_s25  }
   0x9   : > { %p911_p5 = por %p146_p2, %p145_p0  ;;  %p915_p6 = por %p152_p4, %p151_p3 }
   0xa   : > { %p547_p7 = scmp.ge.s32.totalorder %s838_s21, 1  ;;  %p191_p8 = scmp.lt.s32.totalorder %s838_s21, 3 }
   0xc   : > { %p192_p9 = pnand %p547_p7, %p191_p8 }
   0xd   : > { %v230_v0 = vld [vmem:[%s1083_s1] sm:$0xff] (!%p192_p9)  ;;  %v231_v1 = vld [vmem:[%s1083_s1 + $0x8] sm:$0xff] (!%p192_p9)  ;;  %v232_v2 = vld [vmem:[%s1083_s1 + $0x10] sm:$0xff] (!%p192_p9)  ;;  %s549_s11 = sshll.u32 (!%p192_p9), %s894_s22, 2  ;;  %vm250_vm0 = vcmask (!%p192_p9), 818176   ;;  %vm263_vm1 = vcmask (!%p192_p9), 1043456  }
   0xe   : > { %195 = sbr.rel (%p192_p9) target bundleno = 503 (0x1f7), region = 40  ;;  %v671_v3 = vpack.c.bf16 (!%p192_p9), %v231_v1, %v230_v0  ;;  %v233_v4 = vld [vmem:[%s1083_s1 + $0x18] sm:$0xff] (!%p192_p9)  ;;  %p220_p10 = scmp.lt.s32.totalorder (!%p192_p9), %s549_s11, 7  ;;  %v234_v6 = vld [vmem:[%s1083_s1 + $0x20] sm:$0xff] (!%p192_p9)  ;;  %v235_v7 = vld [vmem:[%s1083_s1 + $0x28] sm:$0xff] (!%p192_p9) }
   0xf   : > { %v675_v5 = vpack.c.bf16 (!%p192_p9), %v233_v4, %v232_v2  ;;  %v356_v8 = vld [vmem:[%s1085_s3] sm:$0xff] (!%p192_p9)  ;;  %v357_v9 = vld [vmem:[%s1085_s3 + $0x8] sm:$0xff] (!%p192_p9)  ;;  %v679_v10 = vpack.c.bf16 (!%p192_p9), %v235_v7, %v234_v6  ;;  %v358_v12 = vld [vmem:[%s1085_s3 + $0x10] sm:$0xff] (!%p192_p9)  ;;  %s216_s7 = sand.u32 (!%p192_p9), 1, %s830_s19   ;;  %s840_s23 = smov (!%p192_p9), [#allocation2]  }
  0x10   : > { %672 = vmatprep.subr.bf16.mxu0 (!%p192_p9), %v671_v3  ;;  %v695_v11 = vpack.c.bf16 (!%p192_p9), %v357_v9, %v356_v8  ;;  %v359_v13 = vld [vmem:[%s1085_s3 + $0x18] sm:$0xff] (!%p192_p9)  ;;  %v236_v14 = vld [vmem:[%s1083_s1 + $0x30] sm:$0xff] (!%p192_p9)  ;;  %v360_v18 = vld [vmem:[%s1085_s3 + $0x20] sm:$0xff] (!%p192_p9)  ;;  %s548_s8 = sshll.u32 (!%p192_p9), %s216_s7, 5  ;;  %s780_s25 = sshll.u32 (!%p192_p9), %s840_s23, 4  ;;  %s781_s25 = int_to_ptr.vmem [resolvable:$false] %s780_s25 }
  0x11   : > { %674 = vmatpush3.bf16.msra.mxu0 (!%p192_p9), %v671_v3  ;;  %v237_v15 = vld [vmem:[%s1083_s1 + $0x38] sm:$0xff] (!%p192_p9)  ;;  %v699_v16 = vpack.c.bf16 (!%p192_p9), %v359_v13, %v358_v12  ;;  %v361_v19 = vld [vmem:[%s1085_s3 + $0x28] sm:$0xff] (!%p192_p9)  ;;  %v238_v21 = vld [vmem:[%s1083_s1 + $0x40] sm:$0xff] (!%p192_p9)  ;;  %s218_s12 = scalar_lea.vmem (!%p192_p9), [#allocation2], %s548_s8  ;;  %s782_s26 = scalar_lea.vmem (!%p192_p9), %s781_s25, 1024 }
  0x12   : > { %676 = vmatprep.subr.bf16.mxu0 (!%p192_p9), %v675_v5  ;;  %696 = vmatprep.subr.bf16.mxu1 (!%p192_p9), %v695_v11  ;;  %v683_v20 = vpack.c.bf16 (!%p192_p9), %v237_v15, %v236_v14  ;;  %v239_v22 = vld [vmem:[%s1083_s1 + $0x48] sm:$0xff] (!%p192_p9)  ;;  %v703_v23 = vpack.c.bf16 (!%p192_p9), %v361_v19, %v360_v18  ;;  %v362_v24 = vld [vmem:[%s1085_s3 + $0x30] sm:$0xff] (!%p192_p9)  ;;  %v363_v25 = vld [vmem:[%s1085_s3 + $0x38] sm:$0xff] (!%p192_p9)  ;;  %s482_s13 = sshll.u32 (!%p192_p9), %s218_s12, 4  ;;  %s1032_s13 = int_to_ptr.vmem [resolvable:$true] %s482_s13 }
  0x13   : > { %698 = vmatpush3.bf16.msra.mxu1 (!%p192_p9), %v695_v11  ;;  %v687_v26 = vpack.c.bf16 (!%p192_p9), %v239_v22, %v238_v21  ;;  %v240_v27 = vld [vmem:[%s1083_s1 + $0x50] sm:$0xff] (!%p192_p9)  ;;  %v241_v28 = vld [vmem:[%s1083_s1 + $0x58] sm:$0xff] (!%p192_p9)  ;;  %v707_v29 = vpack.c.bf16 (!%p192_p9), %v363_v25, %v362_v24  ;;  %v242_v31 = vld [vmem:[%s1083_s1 + $0x60] sm:$0xf] (!%p192_p9)  ;;  %p783_p0 = scmp.lt.s32.totalorder (!%p192_p9), %s1032_s13, %s781_s25 }
  0x14   : > { %700 = vmatprep.subr.bf16.mxu1 (!%p192_p9), %v699_v16  ;;  %v691_v30 = vpack.c.bf16 (!%p192_p9), %v241_v28, %v240_v27  ;;  %v364_v35 = vld [vmem:[%s1085_s3 + $0x40] sm:$0xff] (!%p192_p9)  ;;  %v365_v36 = vld [vmem:[%s1085_s3 + $0x48] sm:$0xff] (!%p192_p9)  ;;  %v366_v38 = vld [vmem:[%s1085_s3 + $0x50] sm:$0xff] (!%p192_p9) }
  0x15   : > { %s1095_s11 = smov (!%p220_p10, %s549_s11), 7  ;;  %678 = vmatpush3.bf16.msra.mxu0 %v675_v5  ;;  %v711_v37 = vpack.c.bf16 %v365_v36, %v364_v35  ;;  %v367_v39 = vld [vmem:[%s1085_s3 + $0x58] sm:$0xff]  ;;  %v368_v41 = vld [vmem:[%s1085_s3 + $0x60] sm:$0xff]  ;;  %v369_v42 = vld [vmem:[%s1085_s3 + $0x68] sm:$0xff] }
  0x16   : > { %s550_s6 = sshll.u32 %s1095_s11, 3  ;;  %680 = vmatprep.subr.bf16.mxu0 %v679_v10  ;;  %v715_v40 = vpack.c.bf16 %v367_v39, %v366_v38  ;;  %v719_v43 = vpack.c.bf16 %v369_v42, %v368_v41  ;;  %v370_v44 = vld [vmem:[%s1085_s3 + $0x70] sm:$0xff]  ;;  %v371_v45 = vld [vmem:[%s1085_s3 + $0x78] sm:$0xff]  ;;  %v551_v47 = vld [vmem:[%s1084_s2] ss:$0 sm:$0xff]  ;;  %s776_s11 = scalar_lea.vmem %s1032_s13, 512 }
  0x17   : > { %s961_s17 = scalar_lea.vmem %s1082_s0, %s550_s6  ;;  %702 = vmatpush3.bf16.msra.mxu1 %v699_v16  ;;  %v723_v46 = vpack.c.bf16 %v371_v45, %v370_v44  ;;  %v557_v60 = vld [vmem:[%s1086_s4] ss:$0 sm:$0xff]  ;;  %p777_p11 = scmp.ne.s32.totalorder %s1032_s13, %s776_s11 }
  0x18   : > { %v226_v17 = vld [vmem:[%s961_s17] sm:$0xff]  ;;  %704 = vmatprep.subr.bf16.mxu1 %v703_v23  ;;  %v227_v32 = vld [vmem:[%s961_s17 + $0x8] sm:$0xff]  ;;  %v228_v33 = vld [vmem:[%s961_s17 + $0x10] sm:$0xff]  ;;  %p784_p1 = scmp.lt.s32.totalorder %s782_s26, %s776_s11 }
  0x19   : > { %627 = vmatprep.mubr.msk.f32.mxu0 %vm250_vm0, %v226_v17  ;;  %682 = vmatpush3.bf16.msra.mxu0 %v679_v10  ;;  %v229_v34 = vld [vmem:[%s961_s17 + $0x18] sm:$0xff]  ;;  %s563_s17 = sshll.u32 %s894_s22, 9  ;;  %s1041_s22 = scalar_lea.sflag [#allocation3], %s216_s7 }
  0x1a   : > { %684 = vmatprep.subr.bf16.mxu0 %v683_v20  ;;  %s1037_s16 = scalar_lea.hbm %s1087_s5, %s563_s17  ;;  %p778_p12 = pnand %p777_p11, %p911_p5 }
  0x1b   : > { %706 = vmatpush3.bf16.msra.mxu1 %v703_v23  ;;  %p785_p2 = por %p784_p1, %p783_p0 }
  0x1c   : > { %708 = vmatprep.subr.bf16.mxu1 %v707_v29  ;;  %p779_p13 = pneg %p778_p12 }
  0x1d   : > { %686 = vmatpush3.bf16.msra.mxu0 %v683_v20 }
  0x1e   : > { %688 = vmatprep.subr.bf16.mxu0 %v687_v26  ;;  %p786_p3 = pnand %p785_p2, %p779_p13 }
  0x1f   : > { %710 = vmatpush3.bf16.msra.mxu1 %v707_v29 }
  0x20   : > { %712 = vmatprep.subr.bf16.mxu1 %v711_v37 }
  0x21   : > { %690 = vmatpush3.bf16.msra.mxu0 %v687_v26 }
  0x22   : > { %692 = vmatprep.subr.bf16.mxu0 %v691_v30 }
  0x23   : > { %714 = vmatpush3.bf16.msra.mxu1 %v711_v37 }
  0x24   : > { %716 = vmatprep.subr.bf16.mxu1 %v715_v40 }
  0x25   : > { %694 = vmatpush3.bf16.msra.mxu0 %v691_v30 }
  0x26   : > { %625 = vmatprep.subr.msk.mxu0 %vm263_vm1, %v242_v31 }
  0x27   : > { %718 = vmatpush3.bf16.msra.mxu1 %v715_v40 }
  0x28   : > { %720 = vmatprep.subr.bf16.mxu1 %v719_v43 }
  0x29   : > { %626 = vmatpush3.msk.msra.mxu0 %vm263_vm1, %v242_v31 }
  0x2a   : > { %628 = vmatmul.mubr.msk.f32.vlgmr.msra.gmra.mrb[0].mxu0 %vm250_vm0, %v227_v32 }
  0x2b   : > { %630 = vmatprep.mubr.msk.f32.mxu0 %vm250_vm0, %v228_v33  ;;  %722 = vmatpush3.bf16.msra.mxu1 %v719_v43 }
  0x2c   : > { %724 = vmatprep.subr.bf16.mxu1 %v723_v46 }
  0x2e   : > { %631 = vmatmul.mubr.msk.f32.gmra.mrb[2].mxu0 %vm250_vm0, %v229_v34 }
  0x2f   : > { %726 = vmatpush3.bf16.msra.mxu1 %v723_v46 }
  0xfd   : > { %v629_v48 = vpop.f32.mrb[0].mxu0 }
  0xfe   : > { %v339_v49 = vadd.f32 %v629_v48, %v551_v47  ;;  %v333_v50 = vpop.f32.mrb[1].mxu0 }
  0xff   : > { %v334_v51 = vadd.f32 %v551_v47, %v333_v50 }
 0x101   : > { %768 = vtanh.f32 %v334_v51  ;;  %v632_v52 = vpop.f32.mrb[2].mxu0 }
 0x102   : > { %770 = vtanh.f32 %v339_v49  ;;  %v349_v53 = vadd.f32 %v632_v52, %v551_v47  ;;  %v343_v54 = vpop.f32.mrb[3].mxu0 }
 0x103   : > { %v344_v55 = vadd.f32 %v551_v47, %v343_v54 }
 0x105   : > { %772 = vtanh.f32 %v344_v55 }
 0x106   : > { %774 = vtanh.f32 %v349_v53 }
 0x10b   : > { %v769_v56 = vpop.eup %768 }
 0x10c   : > { %v771_v57 = vpop.eup %770  ;;  %665 = vmatprep.mubr.f32.mxu1 %v769_v56 }
 0x10d   : > { %666 = vmatmul.mubr.f32.vlgmr.msra.gmra.mrb[0].mxu1 %v771_v57 }
 0x10f   : > { %v773_v58 = vpop.eup %772 }
 0x110   : > { %v775_v59 = vpop.eup %774  ;;  %668 = vmatprep.mubr.f32.mxu1 %v773_v58 }
 0x111   : > { %669 = vmatmul.mubr.f32.gmra.mrb[2].mxu1 %v775_v59 }
 0x1e0   : > { %v667_v61 = vpop.f32.mrb[0].mxu1 }
 0x1e1   : > { %v451_v62 = vadd.f32 %v667_v61, %v557_v60  ;;  %v445_v63 = vpop.f32.mrb[1].mxu1 }
 0x1e2   : > { %v446_v0 = vadd.f32 %v557_v60, %v445_v63 }
 0x1e3   : > { %465 = vst.msk [vmem:[%s218_s12 + $0x8] sm:$0xff] %vm250_vm0, %v451_v62 }
 0x1e4   : > { %464 = vst.msk [vmem:[%s218_s12] sm:$0xff] %vm250_vm0, %v446_v0  ;;  %v670_v1 = vpop.f32.mrb[2].mxu1 }
 0x1e5   : > { %v461_v2 = vadd.f32 %v670_v1, %v557_v60  ;;  %v455_v3 = vpop.f32.mrb[3].mxu1 }
 0x1e6   : > { %v456_v4 = vadd.f32 %v557_v60, %v455_v3 }
 0x1e7   : > { %467 = vst.msk [vmem:[%s218_s12 + $0x18] sm:$0xff] %vm250_vm0, %v461_v2 }
 0x1e8   : > { %466 = vst.msk [vmem:[%s218_s12 + $0x10] sm:$0xff] %vm250_vm0, %v456_v4 }
 0x1e9   : > { %789 = shalt.err (!%p786_p3)
}
 0x1ea   : > { %s790_s30 = scalar_lea.hbm %s1037_s16, 512  ;;  %s794_s8 = scalar_lea.hbm %s1087_s5, 1024 }
 0x1eb   : > { %p791_p4 = scmp.ne.s32.totalorder %s1037_s16, %s790_s30  ;;  %p795_p9 = scmp.lt.u32.totalorder %s1037_s16, %s1087_s5 }
 0x1ec   : > { %p796_p10 = scmp.lt.u32.totalorder %s794_s8, %s790_s30  ;;  %p798_p12 = scmp.lt.u32.totalorder %s790_s30, %s1037_s16 }
 0x1ed   : > { %p792_p7 = pnand %p791_p4, %p911_p5 }
 0x1ee   : > { %p797_p11 = por %p796_p10, %p795_p9 }
 0x1ef   : > { %p793_p8 = pneg %p792_p7 }
 0x1f0   : > { %p799_p13 = por %p798_p12, %p797_p11 }
 0x1f2   : > { %p800_p0 = pnand %p799_p13, %p793_p8 }
 0x1f4   : > { %803 = shalt.err (!%p800_p0)
}
 0x1f5   : > { %s841_s12 = smov 128   ;;  %s842_s17 = smov 8  }
 0x1f6   : > { %727 = dma.vmem_to_hbm [thread:$0]  (%p911_p5), %s1032_s13, 512, %s1037_s16, %s1041_s22, %s841_s12, %s841_s12, %s842_s17  }
 0x1f7 PF: > { %p733_p1 = scmp.ge.s32.totalorder %s838_s21, 2  ;;  %s497_s14 = sand.u32 1, %s826_s18  }
 0x1f8   : > { %s498_s15 = scalar_lea.sflag [#allocation3], %s497_s14 }
 0x1f9   : > { %p730_p2 = pnand %p733_p1, %p915_p6 }
 0x1fb   : > { %821 = dma.done.wait (!%p730_p2), %s498_s15, 512  }
 0x1fc   : > { %823 = vsyncadd (!%p730_p2), %s498_s15, 4294966784  ;;  %p15_p3 = scmp.ge.s32.totalorder %s898_s24, 4   ;;  %s1090_s18 = smov %s830_s19 }
 0x1fd   : > { %s1091_s19 = smov %s834_s20  ;;  %s1092_s20 = smov %s909_s27 }
 0x1fe   : > { %s1093_s21 = smov %s898_s24  ;;  %17 = sbr.rel (!%p15_p3) target bundleno = 3 (0x3), region = 75 }
 0x205   :  { %503 = vsyncpa [#allocation3], 1 }
 0x206   :  { %505 = vsyncpa [#allocation3 + $0x1], 1 }

</bundles_post_ra>
